<compile_context>
chip_gen: v5e
topology: v5e:2x2
jax: 0.10.0
libtpu: 0.0.40
codegen_flags: <defaults>
</compile_context>

<pallas_src>
import jax
import jax.numpy as jnp
from jax.experimental import pallas as pl
from jax.experimental.pallas import tpu as pltpu


def _head_kernel(x_ref, w1t_ref, b1_ref, w2_ref, b2_ref, o_ref):
    # x_ref:   (1, C, TN)   pixels on lanes, channels on sublanes
    # w1t_ref: (HID, C)     transposed 1x1-conv weight
    # b1_ref:  (HID, 1)
    # w2_ref:  (HID, 1)
    # b2_ref:  (1,) in SMEM (scalar)
    # o_ref:   (1, 1, TN)   lane-dense output
    x = x_ref[0]                                                    # (C, TN)
    h = jnp.dot(w1t_ref[...], x, preferred_element_type=jnp.float32)  # (HID, TN) on MXU
    h = jnp.maximum(h + b1_ref[...], 0.0)                           # VPU
    # Second projection has output width 1 -> VPU multiply + sublane reduce,
    # skip the MXU entirely.
    y = jnp.sum(h * w2_ref[...], axis=0, keepdims=True) + b2_ref[0]  # (1, TN)
    o_ref[0] = y.astype(o_ref.dtype)


def _round_up(x, m):
    return ((x + m - 1) // m) * m


def base_model_forward(x_nchw, params, *, tn_max=2048):
    """Runs the BaseModel stand-in pipeline. x_nchw: [N, C, H, W] float32."""
    w1, b1, w2, b2 = params          # (C,HID), (1,HID), (HID,1), (1,1)
    n, c, h, w = x_nchw.shape
    hid = w1.shape[1]

    # Pure reshape (no transpose): NCHW -> (N, C, H*W); pixels land on lanes.
    hw = h * w
    x3d = x_nchw.reshape(n, c, hw)

    # Pick a lane tile (multiple of 128) and pad the pixel axis to fit.
    tn = min(tn_max, _round_up(hw, 128))
    hw_pad = _round_up(hw, tn)
    if hw_pad != hw:
        x3d = jnp.pad(x3d, ((0, 0), (0, 0), (0, hw_pad - hw)))

    # Re-orient the (tiny) weights once for the flipped layout.
    w1t = jnp.transpose(w1)          # (HID, C)
    b1c = b1.reshape(hid, 1)         # (HID, 1)
    w2c = w2.reshape(hid, 1)         # (HID, 1)
    b2s = b2.reshape(1)              # (1,)  -> SMEM scalar

    grid = (n, hw_pad // tn)

    out3d = pl.pallas_call(
        _head_kernel,
        out_shape=jax.ShapeDtypeStruct((n, 1, hw_pad), jnp.float32),
        grid_spec=pltpu.PrefetchScalarGridSpec(
            num_scalar_prefetch=0,
            grid=grid,
            in_specs=[
                pl.BlockSpec((1, c, tn), lambda i, p: (i, 0, p)),    # x tile
                pl.BlockSpec((hid, c), lambda i, p: (0, 0)),         # w1^T (full)
                pl.BlockSpec((hid, 1), lambda i, p: (0, 0)),         # b1 (full)
                pl.BlockSpec((hid, 1), lambda i, p: (0, 0)),         # w2 (full)
                pl.BlockSpec(memory_space=pltpu.MemorySpace.SMEM),   # b2 scalar
            ],
            out_specs=pl.BlockSpec((1, 1, tn), lambda i, p: (i, 0, p)),
        ),
        compiler_params=pltpu.CompilerParams(
            dimension_semantics=("parallel", "parallel")),
    )(x3d, w1t, b1c, w2c, b2s)

    # Strip pixel padding; pure reshape back to NCHW [N, 1, H, W].
    return out3d[:, :, :hw].reshape(n, 1, h, w)


def init_params(c=4, hid=32, seed=0):
    k1, k2, k3, k4 = jax.random.split(jax.random.PRNGKey(seed), 4)
    w1 = jax.random.normal(k1, (c, hid), jnp.float32) * 0.1
    b1 = jax.random.normal(k2, (1, hid), jnp.float32) * 0.01
    w2 = jax.random.normal(k3, (hid, 1), jnp.float32) * 0.1
    b2 = jax.random.normal(k4, (1, 1), jnp.float32) * 0.01
    return w1, b1, w2, b2


def reference_forward(x_nchw, params):
    # PyTorch-equivalent reference in the original NHWC-matmul orientation.
    w1, b1, w2, b2 = params
    n, c, h, w = x_nchw.shape
    x2d = jnp.transpose(x_nchw, (0, 2, 3, 1)).reshape(-1, c)
    hdd = jnp.maximum(x2d @ w1 + b1, 0.0)
    y = hdd @ w2 + b2
    return y.reshape(n, h, w, 1).transpose(0, 3, 1, 2)


if __name__ == "__main__":
    key = jax.random.PRNGKey(0)
    # data = {"input": x} in the PyTorch module; here the sole tensor input.
    x = jax.random.normal(key, (2, 4, 16, 16), jnp.float32)  # NCHW
    params = init_params(c=4, hid=32, seed=0)

    out = base_model_forward(x, params)
    out = jax.block_until_ready(out)

    ref = reference_forward(x, params)
    assert out.shape == (2, 1, 16, 16), out.shape
    assert jnp.allclose(out, ref, atol=1e-4, rtol=1e-4), "mismatch vs reference"

    print("KERNEL_OK")
</pallas_src>

<mosaic_0001>
module attributes {stable_mosaic.version = 11 : i64} {
  func.func @_head_kernel(%arg0: i32, %arg1: i32, %arg2: memref<1x4x256xf32, #tpu.memory_space<vmem>>, %arg3: memref<32x4xf32, #tpu.memory_space<vmem>>, %arg4: memref<32x1xf32, #tpu.memory_space<vmem>>, %arg5: memref<32x1xf32, #tpu.memory_space<vmem>>, %arg6: memref<1xf32, #tpu.memory_space<smem>>, %arg7: memref<1x1x256xf32, #tpu.memory_space<vmem>>) attributes {dimension_semantics = [#tpu.dimension_semantics<parallel>, #tpu.dimension_semantics<parallel>], iteration_bounds = array<i64: 2, 1>, scalar_prefetch = 0 : i64, scratch_operands = 0 : i64, tpu.core_type = #tpu.core_type<tc>, window_params = [{transform_indices = @transform_0, window_bounds = array<i64: 1, 4, 256>}, {pipeline_mode = #tpu.pipeline_mode<synchronous>, transform_indices = @transform_1, window_bounds = array<i64: 32, 4>}, {pipeline_mode = #tpu.pipeline_mode<synchronous>, transform_indices = @transform_2, window_bounds = array<i64: 32, 1>}, {pipeline_mode = #tpu.pipeline_mode<synchronous>, transform_indices = @transform_3, window_bounds = array<i64: 32, 1>}, {transform_indices = @transform_4, window_bounds = array<i64: 1>}, {transform_indices = @transform_5, window_bounds = array<i64: 1, 1, 256>}]} {
    %c0 = arith.constant 0 : index
    %c0_0 = arith.constant 0 : index
    %c0_1 = arith.constant 0 : index
    %0 = vector.load %arg2[%c0, %c0_0, %c0_1] : memref<1x4x256xf32, #tpu.memory_space<vmem>>, vector<1x4x256xf32>
    %1 = vector.shape_cast %0 : vector<1x4x256xf32> to vector<4x256xf32>
    %c0_2 = arith.constant 0 : index
    %c0_3 = arith.constant 0 : index
    %2 = vector.load %arg3[%c0_2, %c0_3] : memref<32x4xf32, #tpu.memory_space<vmem>>, vector<32x4xf32>
    %cst = arith.constant dense<0.000000e+00> : vector<32x256xf32>
    %3 = tpu.matmul %2, %1, %cst {dimension_numbers = #tpu.dot_dimension_numbers<[1], [0], [0], [1], [0, 0, 1, 1], [], []>} : vector<32x4xf32>, vector<4x256xf32>, vector<32x256xf32> -> vector<32x256xf32>
    %c0_4 = arith.constant 0 : index
    %c0_5 = arith.constant 0 : index
    %4 = vector.load %arg4[%c0_4, %c0_5] : memref<32x1xf32, #tpu.memory_space<vmem>>, vector<32x1xf32>
    %5 = vector.broadcast %4 : vector<32x1xf32> to vector<32x256xf32>
    %6 = arith.addf %3, %5 : vector<32x256xf32>
    %cst_6 = arith.constant 0.000000e+00 : f32
    %7 = vector.broadcast %cst_6 : f32 to vector<32x256xf32>
    %8 = arith.maximumf %6, %7 : vector<32x256xf32>
    %c0_7 = arith.constant 0 : index
    %c0_8 = arith.constant 0 : index
    %9 = vector.load %arg5[%c0_7, %c0_8] : memref<32x1xf32, #tpu.memory_space<vmem>>, vector<32x1xf32>
    %10 = vector.broadcast %9 : vector<32x1xf32> to vector<32x256xf32>
    %11 = arith.mulf %8, %10 : vector<32x256xf32>
    %cst_9 = arith.constant dense<0.000000e+00> : vector<256xf32>
    %12 = vector.multi_reduction <add>, %11, %cst_9 [0] : vector<32x256xf32> to vector<256xf32>
    %13 = vector.shape_cast %12 : vector<256xf32> to vector<1x256xf32>
    %c0_10 = arith.constant 0 : index
    %14 = memref.load %arg6[%c0_10] : memref<1xf32, #tpu.memory_space<smem>>
    %15 = vector.broadcast %14 : f32 to vector<1x256xf32>
    %16 = arith.addf %13, %15 : vector<1x256xf32>
    %c0_11 = arith.constant 0 : index
    %c0_12 = arith.constant 0 : index
    %c0_13 = arith.constant 0 : index
    %17 = vector.load %arg7[%c0_11, %c0_12, %c0_13] : memref<1x1x256xf32, #tpu.memory_space<vmem>>, vector<1x1x256xf32>
    %18 = vector.shape_cast %17 : vector<1x1x256xf32> to vector<1x256xf32>
    %19 = vector.shape_cast %16 : vector<1x256xf32> to vector<1x1x256xf32>
    tpu.vector_store %arg7[%c0_11, %c0_12, %c0_13], %19 {strides = array<i32>} : memref<1x1x256xf32, #tpu.memory_space<vmem>>, vector<1x1x256xf32>,
    return
  }
  func.func @transform_0(%arg0: i32, %arg1: i32) -> (i32, i32, i32) {
    %c0_i32 = arith.constant 0 : i32
    %c0_i32_0 = arith.constant 0 : i32
    return %arg0, %c0_i32, %arg1 : i32, i32, i32
  }
  func.func @transform_1(%arg0: i32, %arg1: i32) -> (i32, i32) {
    %c0_i32 = arith.constant 0 : i32
    %c0_i32_0 = arith.constant 0 : i32
    %c0_i32_1 = arith.constant 0 : i32
    return %c0_i32, %c0_i32_0 : i32, i32
  }
  func.func @transform_2(%arg0: i32, %arg1: i32) -> (i32, i32) {
    %c0_i32 = arith.constant 0 : i32
    %c0_i32_0 = arith.constant 0 : i32
    %c0_i32_1 = arith.constant 0 : i32
    return %c0_i32, %c0_i32_0 : i32, i32
  }
  func.func @transform_3(%arg0: i32, %arg1: i32) -> (i32, i32) {
    %c0_i32 = arith.constant 0 : i32
    %c0_i32_0 = arith.constant 0 : i32
    %c0_i32_1 = arith.constant 0 : i32
    return %c0_i32, %c0_i32_0 : i32, i32
  }
  func.func @transform_4(%arg0: i32, %arg1: i32) -> i32 {
    %c0_i32 = arith.constant 0 : i32
    %c0_i32_0 = arith.constant 0 : i32
    return %c0_i32 : i32
  }
  func.func @transform_5(%arg0: i32, %arg1: i32) -> (i32, i32, i32) {
    %c0_i32 = arith.constant 0 : i32
    %c0_i32_0 = arith.constant 0 : i32
    return %arg0, %c0_i32, %arg1 : i32, i32, i32
  }
}

</mosaic_0001>

<bundles_post_ra>
// kernel: tpu_custom_call.1
= control target key start
LH: loop header
LB: loop body
LE: loop exit
PB: predicated region body
PF: predicated region fallthrough
CT: control target
= control target key end

     0   :  { %s869_s0 = inlined_call_operand.vmem [shape: f32[2,4,256], index: 0, kind: input, shape index: {}]   ;;  %s870_s1 = inlined_call_operand.vmem [shape: f32[32,4], index: 1, kind: input, shape index: {}]   ;;  %s871_s2 = inlined_call_operand.vmem [shape: f32[32,1], index: 2, kind: input, shape index: {}]   ;;  %s872_s3 = inlined_call_operand.vmem [shape: f32[32,1], index: 3, kind: input, shape index: {}]   ;;  %s873_s4 = inlined_call_operand.<no memory space> [shape: f32[1], index: 4, kind: input, shape index: {}]   ;;  %s874_s5 = inlined_call_operand.hbm [shape: f32[2,1,256], index: 5, kind: output, shape index: {}]  }
   0x1   :  { %10 = sst [smem:[#allocation2]] %s873_s4 }
   0x2   :  { %11 = vsyncpa [#allocation4], 0 }
   0x3   :  { %13 = vsyncpa [#allocation4 + $0x1], 0  ;;  %s728_s20 = smov 0   ;;  %s730_s21 = smov 0  }
   0x4   :  { %s732_s22 = smov 0   ;;  %s734_s23 = smov 0  }
   0x5   :  { %s736_s24 = smov 0   ;;  %s738_s25 = smov 0  }
   0x6 LB: > { %s530_s4 = sadd.s32 4294967295, %s692_s25   ;;  %s531_s26 = sadd.s32 4294967294, %s692_s25   ;;  %s692_s25 = sphi %s738_s25, %s19_s25   ;;  %s688_s24 = sphi %s736_s24, %s881_s24   ;;  %s684_s23 = sphi %s734_s23, %s880_s23   ;;  %s680_s22 = sphi %s732_s22, %s879_s22   ;;  %s676_s21 = sphi %s730_s21, %s878_s21   ;;  %s672_s20 = sphi %s728_s20, %s877_s20  }
   0x7   : > { %s31_s27 = sadd.s32 1, %s688_s24  ;;  %s152_s28 = sadd.s32 1, %s680_s22 }
   0x8   : > { %p33_p0 = scmp.ge.s32.totalorder %s31_s27, 2  ;;  %p162_p1 = scmp.ne.s32.totalorder %s680_s22, %s676_s21 }
   0x9   : > { %p163_p2 = scmp.eq.s32.totalorder %s530_s4, 1  ;;  %p168_p3 = scmp.ne.s32.totalorder %s676_s21, %s672_s20 }
   0xa   : > { %s883_s27 = smov (%p33_p0, %s31_s27), 0  ;;  %p169_p5 = scmp.eq.s32.totalorder %s531_s26, 1 }
   0xb   : > { %p768_p4 = por %p163_p2, %p162_p1  ;;  %s147_s30 = ssub.s32 %s688_s24, %s883_s27 }
   0xc   : > { %p534_p6 = scmp.ge.s32.totalorder %s692_s25, 1  ;;  %p150_p7 = scmp.eq.s32.totalorder %s147_s30, 0 }
   0xd   : > { %p775_p8 = por %p169_p5, %p168_p3  ;;  %p212_p9 = scmp.lt.s32.totalorder %s692_s25, 3 }
   0xe   : > { %s781_s7 = scalar_select %p150_p7, %s680_s22, %s152_s28  }
   0xf   : > { %p213_p10 = pnand %p534_p6, %p212_p9 }
  0x10   : > { %p245_p11 = scmp.lt.s32.totalorder (!%p213_p10), %s684_s23, 1  ;;  %s422_s26 = sld [smem:[#allocation2]] (!%p213_p10) }
  0x11   : > { %216 = sbr.rel (%p213_p10) target bundleno = 206 (0xce), region = 40  ;;  %s241_s28 = sand.u32 (!%p213_p10), 1, %s676_s21  }
  0x12   : > { %s535_s30 = sshll.u32 (!%p213_p10), %s241_s28, 1  ;;  %s549_s8 = sshll.u32 (!%p213_p10), %s684_s23, 1 }
  0x13   : > { %s450_s11 = scalar_lea.hbm (!%p213_p10), %s874_s5, %s549_s8  ;;  %s634_s19 = scalar_lea.hbm (!%p213_p10), %s874_s5, 4 }
  0x14   : > { %s454_s14 = sshll.u32 (!%p213_p10), %s450_s11, 4  ;;  %s455_s14 = int_to_ptr.hbm [resolvable:$true] %s454_s14 }
  0x16   : > { %v260_v0 = vld [vmem:[%s871_s2] sm:$0xff]  ;;  %v262_v1 = vld [vmem:[%s871_s2 + $0x10] sm:$0xff]  ;;  %v694_v2 = vmov 0   ;;  %s246_s12 = scalar_select %p245_p11, %s684_s23, 1  ;;  %v261_v5 = vld [vmem:[%s871_s2 + $0x8] sm:$0xff]  ;;  %vm301_vm0 = vcmask 1043456  }
  0x17   : > { %611 = vset.pattern.permute.xlu0 %v694_v2  ;;  %612 = vset.pattern.permute.xlu1 %v694_v2  ;;  %v372_v3 = vld [vmem:[%s872_s3] sm:$0xff]  ;;  %v263_v6 = vld [vmem:[%s871_s2 + $0x18] sm:$0xff]  ;;  %v373_v7 = vld [vmem:[%s872_s3 + $0x8] sm:$0xff]  ;;  %vm288_vm1 = vcmask 31744   ;;  %vm429_vm2 = vcmask 1040384   ;;  %s438_s23 = scalar_lea.sflag [#allocation4], %s241_s28 }
  0x18   : > { %266 = vperm.xlu0 %611, %v260_v0   ;;  %276 = vperm.xlu1 %612, %v262_v1   ;;  %s552_s15 = sshll.u32 %s246_s12, 3  ;;  %v256_v8 = vld [vmem:[%s870_s1] sm:$0xff]  ;;  %v258_v9 = vld [vmem:[%s870_s1 + $0x10] sm:$0xff]  ;;  %v375_v13 = vld [vmem:[%s872_s3 + $0x18] sm:$0xff]  ;;  %s243_s12 = scalar_lea.vmem [#allocation3], %s535_s30 }
  0x19   : > { %613 = vset.pattern.permute.xlu2 %v694_v2  ;;  %s252_s18 = scalar_lea.vmem %s869_s0, %s552_s15  ;;  %v374_v12 = vld [vmem:[%s872_s3 + $0x10] sm:$0xff]  ;;  %v257_v14 = vld [vmem:[%s870_s1 + $0x8] sm:$0xff]  ;;  %v259_v15 = vld [vmem:[%s870_s1 + $0x18] sm:$0xff]  ;;  %s452_s13 = sshll.u32 %s243_s12, 4  ;;  %s453_s13 = int_to_ptr.vmem [resolvable:$true] %s452_s13 }
  0x1a   : > { %378 = vperm.xlu2 %613, %v372_v3   ;;  %v255_v4 = vld [vmem:[%s252_s18] sm:$0xff]  ;;  %s628_s15 = sshra.s32 %s455_s14, 4  ;;  %s629_s15 = int_to_ptr.hbm [resolvable:$true] %s628_s15 }
  0x1b   : > { %285 = vst [vmem:[#allocation1] ss:$2 sm:$0xff] %v255_v4  ;;  %s630_s16 = scalar_lea.hbm %s629_s15, 2  ;;  %p635_p1 = scmp.lt.s32.totalorder %s629_s15, %s874_s5 }
  0x1c   : > { %p631_p12 = scmp.ne.s32.totalorder %s629_s15, %s630_s16  ;;  %p636_p2 = scmp.lt.s32.totalorder %s634_s19, %s630_s16 }
  0x1e   : > { %p632_p13 = pnand %p631_p12, %p768_p4  ;;  %p637_p3 = por %p636_p2, %p635_p1 }
  0x20   : > { %271 = vperm.xlu0 %611, %v261_v5   ;;  %281 = vperm.xlu1 %612, %v263_v6   ;;  %p633_p0 = pneg %p632_p13 }
  0x22   : > { %383 = vperm.xlu2 %613, %v373_v7   ;;  %v286_v10 = vld.sshfl [vmem:[#allocation1] sm:$0xff pattern:$0x75316420]  ;;  %v287_v11 = vld.sshfl [vmem:[#allocation1 + $0x8] sm:$0xff pattern:$0x75316420]  ;;  %p638_p5 = pnand %p637_p3, %p633_p0 }
  0x23   : > { %538 = vmatpush.msk.msra.mxu0 %vm301_vm0, %v286_v10  ;;  %553 = vmatpush.msk.msra.mxu2 %vm301_vm0, %v286_v10 }
  0x24   : > { %543 = vmatpush.msk.msra.mxu1 %vm301_vm0, %v287_v11  ;;  %554 = vmatpush.msk.msra.mxu3 %vm301_vm0, %v287_v11  ;;  %v432_v11 = vlaneseq }
  0x25   : > { %539 = vmatmul.msk.f32.vlgmr.msra.gmra.mxu0 %vm288_vm1, %v256_v8  ;;  %541 = vmatmul.msk.f32.vlgmr.msra.gmra.mxu2 %vm288_vm1, %v258_v9 }
  0x26   : > { %544 = vmatmul.msk.f32.vlgmr.msra.gmra.mxu1 %vm288_vm1, %v256_v8  ;;  %546 = vmatmul.msk.f32.vlgmr.msra.gmra.mxu3 %vm288_vm1, %v258_v9  ;;  %v423_v8 = vstv %s422_s26  ;;  %vm434_vm3 = vcmp.lt.s32.totalorder %v432_v11, 256 }
  0x28   : > { %388 = vperm.xlu0 %611, %v374_v12   ;;  %393 = vperm.xlu1 %612, %v375_v13  }
  0x2d   : > { %540 = vmatmul.msk.f32.gmra.mxu0 %vm288_vm1, %v257_v14  ;;  %542 = vmatmul.msk.f32.gmra.mxu2 %vm288_vm1, %v259_v15 }
  0x2e   : > { %545 = vmatmul.msk.f32.gmra.mxu1 %vm288_vm1, %v257_v14  ;;  %547 = vmatmul.msk.f32.gmra.mxu3 %vm288_vm1, %v259_v15 }
  0x74   : > { %v379_v20 = vpop.permute.xlu2 %378 }
  0x7c   : > { %v384_v36 = vpop.permute.xlu2 %383 }
  0x8a   : > { %v267_v16 = vpop.permute.xlu0 %266  ;;  %v277_v17 = vpop.permute.xlu1 %276 }
  0x92   : > { %v272_v22 = vpop.permute.xlu0 %271  ;;  %v282_v26 = vpop.permute.xlu1 %281 }
  0x9a   : > { %v389_v48 = vpop.permute.xlu0 %388  ;;  %v394_v53 = vpop.permute.xlu1 %393 }
  0xa2   : > { %v323_v18 = vpop.f32.mrf.mxu0 }
  0xa3   : > { %v352_v19 = vpop.f32.mrf.mxu1  ;;  %v324_v21 = vadd.f32 %v323_v18, %v267_v16 }
  0xa4   : > { %v353_v23 = vadd.f32 %v352_v19, %v267_v16 }
  0xa5   : > { %v364_v28 = vmax.f32 %v324_v21, 0.0 }
  0xa6   : > { %v365_v32 = vmax.f32 %v353_v23, 0.0 }
  0xa7   : > { %v396_v38 = vmul.f32 %v379_v20, %v364_v28 }
  0xa8   : > { %v329_v24 = vpop.f32.mrf.mxu2  ;;  %v397_v41 = vmul.f32 %v379_v20, %v365_v32 }
  0xa9   : > { %v358_v25 = vpop.f32.mrf.mxu3  ;;  %v330_v29 = vadd.f32 %v329_v24, %v277_v17 }
  0xaa   : > { %v326_v27 = vpop.f32.mrf.mxu0  ;;  %v359_v33 = vadd.f32 %v358_v25, %v277_v17 }
  0xab   : > { %v327_v30 = vadd.f32 %v326_v27, %v272_v22  ;;  %v355_v31 = vpop.f32.mrf.mxu1  ;;  %v368_v39 = vmax.f32 %v330_v29, 0.0 }
  0xac   : > { %v356_v34 = vadd.f32 %v355_v31, %v272_v22  ;;  %v369_v42 = vmax.f32 %v359_v33, 0.0 }
  0xad   : > { %v366_v35 = vmax.f32 %v327_v30, 0.0  ;;  %v400_v51 = vmul.f32 %v389_v48, %v368_v39 }
  0xae   : > { %v367_v37 = vmax.f32 %v356_v34, 0.0  ;;  %v401_v54 = vmul.f32 %v389_v48, %v369_v42 }
  0xaf   : > { %v398_v40 = vmul.f32 %v384_v36, %v366_v35 }
  0xb0   : > { %v399_v43 = vmul.f32 %v384_v36, %v367_v37  ;;  %v332_v44 = vpop.f32.mrf.mxu2 }
  0xb1   : > { %v404_v45 = vadd.f32 %v398_v40, %v396_v38  ;;  %v333_v46 = vadd.f32 %v332_v44, %v282_v26  ;;  %v361_v47 = vpop.f32.mrf.mxu3 }
  0xb2   : > { %v413_v49 = vadd.f32 %v399_v43, %v397_v41  ;;  %v362_v50 = vadd.f32 %v361_v47, %v282_v26 }
  0xb3   : > { %v370_v52 = vmax.f32 %v333_v46, 0.0  ;;  %v405_v57 = vadd.f32 %v404_v45, %v400_v51 }
  0xb4   : > { %v371_v55 = vmax.f32 %v362_v50, 0.0  ;;  %v414_v59 = vadd.f32 %v413_v49, %v401_v54 }
  0xb5   : > { %v402_v56 = vmul.f32 %v394_v53, %v370_v52 }
  0xb6   : > { %v403_v58 = vmul.f32 %v394_v53, %v371_v55 }
  0xb7   : > { %v406_v60 = vadd.f32 %v405_v57, %v402_v56 }
  0xb8   : > { %v415_v61 = vadd.f32 %v414_v59, %v403_v58 }
  0xb9   : > { %v407_v62 = vrot.slane %v406_v60, 4 }
  0xba   : > { %v416_v63 = vrot.slane %v415_v61, 4 }
  0xbb   : > { %v408_v0 = vadd.f32 %v407_v62, %v406_v60 }
  0xbc   : > { %v417_v1 = vadd.f32 %v416_v63, %v415_v61 }
  0xbd   : > { %v409_v2 = vrot.slane %v408_v0, 2 }
  0xbe   : > { %v418_v3 = vrot.slane %v417_v1, 2 }
  0xbf   : > { %v410_v4 = vadd.f32 %v409_v2, %v408_v0 }
  0xc0   : > { %v419_v5 = vadd.f32 %v418_v3, %v417_v1 }
  0xc1   : > { %v411_v6 = vrot.slane %v410_v4, 1 }
  0xc2   : > { %v420_v7 = vrot.slane %v419_v5, 1 }
  0xc3   : > { %v412_v9 = vadd.f32 %v411_v6, %v410_v4 }
  0xc4   : > { %v421_v10 = vadd.f32 %v420_v7, %v419_v5 }
  0xc5   : > { %v424_v13 = vadd.f32 %v423_v8, %v412_v9 }
  0xc6   : > { %v425_v12 = vadd.f32 %v423_v8, %v421_v10 }
  0xc8   : > { %v428_v14 = vrot.slane %v425_v12, 7 }
  0xca   : > { %v430_v15 = vsel %vm429_vm2, %v424_v13, %v428_v14 }
  0xcb   : > { %436 = vst.msk [vmem:[%s243_s12] sm:$0x3] %vm434_vm3, %v430_v15 }
  0xcc   : > { %641 = shalt.err (!%p638_p5)
}
  0xcd   : > { %555 = dma.vmem_to_hbm [thread:$0]  (%p768_p4), %s453_s13, 32, %s455_s14, %s438_s23  }
  0xce PF: > { %p561_p6 = scmp.ge.s32.totalorder %s692_s25, 2  ;;  %s466_s28 = sand.u32 1, %s672_s20  }
  0xcf   : > { %s467_s30 = scalar_lea.sflag [#allocation4], %s466_s28 }
  0xd0   : > { %p558_p7 = pnand %p561_p6, %p775_p8 }
  0xd2   : > { %p559_p9 = pneg %p558_p7 }
  0xd4   : > { %667 = dma.done.wait (%p559_p9), %s467_s30, 32  }
  0xd5   : > { %669 = vsyncadd (%p559_p9), %s467_s30, 4294967264  ;;  %s19_s25 = sadd.s32 1, %s692_s25   ;;  %s877_s20 = smov %s676_s21 }
  0xd6   : > { %p16_p10 = scmp.ge.s32.totalorder %s19_s25, 4   ;;  %s878_s21 = smov %s680_s22 }
  0xd7   : > { %s879_s22 = smov %s781_s7  ;;  %s880_s23 = smov %s688_s24 }
  0xd8   : > { %s881_s24 = smov %s883_s27  ;;  %18 = sbr.rel (!%p16_p10) target bundleno = 6 (0x6), region = 75 }
  0xdd   :  { %473 = vsyncpa [#allocation4], 1 }
  0xde   :  { %475 = vsyncpa [#allocation4 + $0x1], 1 }

</bundles_post_ra>
